<compile_context>
chip_gen: v6e
topology: v6e:2x2x1
jax: 0.10.0
libtpu: 0.0.40
codegen_flags: <defaults>
</compile_context>

<pallas_src>
import functools

import jax
import jax.numpy as jnp
import numpy as np
from jax import lax
from jax.experimental import pallas as pl
from jax.experimental.pallas import tpu as pltpu


def _gaussian_1d(window_size: int, sigma: float = 1.5) -> np.ndarray:
    xs = np.arange(window_size, dtype=np.float32)
    g = np.exp(-((xs - window_size // 2) ** 2) / float(2 * sigma ** 2)).astype(np.float32)
    return g / g.sum()


def _banded_conv_matrices(window_size: int, H: int, W: int):
    """Constant matrices so that (KhT @ (X @ Kw)) == valid 2-D conv with outer(g, g)."""
    g = _gaussian_1d(window_size)
    Ho, Wo = H - window_size + 1, W - window_size + 1
    kw = np.zeros((W, Wo), dtype=np.float32)       # W-direction (lane) conv as matmul
    for j in range(Wo):
        kw[j:j + window_size, j] = g
    kh_t = np.zeros((Ho, H), dtype=np.float32)     # H-direction (sublane) conv as matmul
    for i in range(Ho):
        kh_t[i, i:i + window_size] = g
    return kw, kh_t


def _ssim_plane_kernel(c_ref, kw_ref, kht_ref, x1_ref, x2_ref, out_ref):
    """One (b, c) plane per grid step: separable gaussian conv (MXU) + SSIM map sum."""
    i = pl.program_id(0)

    x1 = x1_ref[0].astype(jnp.float32)   # (H, W)
    x2 = x2_ref[0].astype(jnp.float32)
    kw = kw_ref[...]                     # (W, Wo)  constant banded matrix
    kht = kht_ref[...]                   # (Ho, H)  constant banded matrix

    def sepconv(x):                      # (H, W) -> (Ho, Wo)
        t = jnp.dot(x, kw, preferred_element_type=jnp.float32)     # lane-dir conv on MXU
        return jnp.dot(kht, t, preferred_element_type=jnp.float32)  # sublane-dir conv on MXU

    # Hoisted products (computed once, reused by the conv of each quantity).
    x11 = x1 * x1
    x22 = x2 * x2
    x12 = x1 * x2

    mu1 = sepconv(x1)
    mu2 = sepconv(x2)
    e11 = sepconv(x11)
    e22 = sepconv(x22)
    e12 = sepconv(x12)

    mu1_sq = mu1 * mu1
    mu2_sq = mu2 * mu2
    mu1_mu2 = mu1 * mu2
    sigma1_sq = e11 - mu1_sq
    sigma2_sq = e22 - mu2_sq
    sigma12 = e12 - mu1_mu2

    c1 = c_ref[0]
    c2 = c_ref[1]
    ssim_map = ((2.0 * mu1_mu2 + c1) * (2.0 * sigma12 + c2)) / (
        (mu1_sq + mu2_sq + c1) * (sigma1_sq + sigma2_sq + c2)
    )

    # Per-plane partial sum; the global mean is finished in the wrapper.
    out_ref[i] = jnp.sum(ssim_map)


def ssim_loss_pallas(img1, img2, window_size: int = 11, size_average: bool = True):
    """Pallas implementation of SSIMLoss.forward (returns scalar 1 - SSIM)."""
    # TODO(synk): size_average=False (per-batch SSIM vector) path not implemented.
    assert size_average, "only size_average=True is implemented"
    assert img1.shape == img2.shape and img1.ndim == 4
    B, C, H, W = img1.shape
    ws = window_size
    Ho, Wo = H - ws + 1, W - ws + 1
    assert Ho >= 1 and Wo >= 1, "window larger than image"
    BC = B * C

    kw_np, kht_np = _banded_conv_matrices(ws, H, W)
    kw = jnp.asarray(kw_np)
    kh_t = jnp.asarray(kht_np)

    # Dynamic range L (val_range=None branch) — global max/min of img1.
    # Cheap scalar pre-pass; passed into the kernel via SMEM so every grid step
    # sees the same global constants.
    max_val = jnp.where(jnp.max(img1) > 128, 255.0, 1.0).astype(jnp.float32)
    min_val = jnp.where(jnp.min(img1) < -0.5, -1.0, 0.0).astype(jnp.float32)
    L = max_val - min_val
    c1c2 = jnp.stack([(0.01 * L) ** 2, (0.03 * L) ** 2]).astype(jnp.float32)

    # Fold batch and channel into a single plane axis (depthwise conv => planes
    # are independent). Inputs keep their original dtype (bf16 stays bf16 in HBM).
    x1 = img1.reshape(BC, H, W)
    x2 = img2.reshape(BC, H, W)

    itemsize = jnp.dtype(x1.dtype).itemsize
    flops = int(BC * (2 * 5 * (H * W * Wo + Ho * H * Wo) + 3 * H * W + 13 * Ho * Wo))
    bytes_accessed = int(2 * BC * H * W * itemsize + (W * Wo + Ho * H) * 4 + 8 + BC * 4)
    cost = pl.CostEstimate(flops=flops, transcendentals=0, bytes_accessed=bytes_accessed)

    # TODO(synk): for very large H/W, add an H-tile grid axis with a (ws-1)-row
    # halo and lane-dense repacking; at these sizes per-plane blocks suffice.
    plane_sums = pl.pallas_call(
        _ssim_plane_kernel,
        out_shape=jax.ShapeDtypeStruct((BC,), jnp.float32),
        grid=(BC,),
        in_specs=[
            pl.BlockSpec(memory_space=pltpu.MemorySpace.SMEM),   # C1, C2 scalars
            pl.BlockSpec(memory_space=pltpu.MemorySpace.VMEM),   # Kw  (W, Wo), resident
            pl.BlockSpec(memory_space=pltpu.MemorySpace.VMEM),   # KhT (Ho, H), resident
            pl.BlockSpec((1, H, W), lambda i: (i, 0, 0)),        # img1 plane, pipelined
            pl.BlockSpec((1, H, W), lambda i: (i, 0, 0)),        # img2 plane, pipelined
        ],
        # Whole output stays resident in SMEM across the grid (each step writes
        # its own element) -> grid axis must be "arbitrary".
        out_specs=pl.BlockSpec(memory_space=pltpu.MemorySpace.SMEM),
        compiler_params=pltpu.CompilerParams(
            dimension_semantics=("arbitrary",),
            vmem_limit_bytes=32 * 1024 * 1024,
        ),
        cost_estimate=cost,
    )(c1c2, kw, kh_t, x1, x2)

    ssim_val = jnp.sum(plane_sums) / jnp.float32(BC * Ho * Wo)
    return jnp.float32(1.0) - ssim_val


def _ssim_loss_ref(img1, img2, window_size: int = 11):
    """Pure-JAX reference (mirrors the PyTorch code) for correctness checking."""
    B, C, H, W = img1.shape
    g = jnp.asarray(_gaussian_1d(window_size))
    w2d = jnp.outer(g, g)
    kernel = jnp.broadcast_to(w2d[None, None], (C, 1, window_size, window_size))

    def dwconv(x):
        return lax.conv_general_dilated(
            x, kernel, window_strides=(1, 1), padding="VALID",
            dimension_numbers=("NCHW", "OIHW", "NCHW"), feature_group_count=C,
            precision=lax.Precision.HIGHEST)

    max_val = jnp.where(jnp.max(img1) > 128.0, 255.0, 1.0)
    min_val = jnp.where(jnp.min(img1) < -0.5, -1.0, 0.0)
    L = max_val - min_val

    img1 = img1.astype(jnp.float32)
    img2 = img2.astype(jnp.float32)
    mu1, mu2 = dwconv(img1), dwconv(img2)
    mu1_sq, mu2_sq, mu1_mu2 = mu1 ** 2, mu2 ** 2, mu1 * mu2
    s1 = dwconv(img1 * img1) - mu1_sq
    s2 = dwconv(img2 * img2) - mu2_sq
    s12 = dwconv(img1 * img2) - mu1_mu2
    C1, C2 = (0.01 * L) ** 2, (0.03 * L) ** 2
    ssim_map = (2 * mu1_mu2 + C1) * (2 * s12 + C2) / ((mu1_sq + mu2_sq + C1) * (s1 + s2 + C2))
    return 1.0 - jnp.mean(ssim_map)


if __name__ == "__main__":
    key = jax.random.PRNGKey(0)
    k1, k2 = jax.random.split(key)
    B, C, H, W = 2, 4, 16, 16  # small (B, C, H, W) image input
    img1 = jax.random.uniform(k1, (B, C, H, W), dtype=jnp.float32)
    img2 = jnp.clip(img1 + 0.05 * jax.random.normal(k2, (B, C, H, W), dtype=jnp.float32), 0.0, 1.0)

    loss = jax.block_until_ready(
        ssim_loss_pallas(img1, img2, window_size=11, size_average=True))
    ref = jax.block_until_ready(_ssim_loss_ref(img1, img2, window_size=11))

    np.testing.assert_allclose(np.asarray(loss), np.asarray(ref), rtol=1e-3, atol=1e-4)
    print("KERNEL_OK")
</pallas_src>

<mosaic_0001>
module attributes {stable_mosaic.version = 11 : i64} {
  func.func @_ssim_plane_kernel(%arg0: i32, %arg1: memref<2xf32, #tpu.memory_space<smem>>, %arg2: memref<16x6xf32, #tpu.memory_space<vmem>>, %arg3: memref<6x16xf32, #tpu.memory_space<vmem>>, %arg4: memref<1x16x16xf32, #tpu.memory_space<vmem>>, %arg5: memref<1x16x16xf32, #tpu.memory_space<vmem>>, %arg6: memref<8xf32, #tpu.memory_space<smem>>) attributes {dimension_semantics = [#tpu.dimension_semantics<arbitrary>], iteration_bounds = array<i64: 8>, scalar_prefetch = 0 : i64, scratch_operands = 0 : i64, tpu.core_type = #tpu.core_type<tc>, window_params = [{transform_indices = @transform_0, window_bounds = array<i64: 2>}, {pipeline_mode = #tpu.pipeline_mode<synchronous>, transform_indices = @transform_1, window_bounds = array<i64: 16, 6>}, {pipeline_mode = #tpu.pipeline_mode<synchronous>, transform_indices = @transform_2, window_bounds = array<i64: 6, 16>}, {transform_indices = @transform_3, window_bounds = array<i64: 1, 16, 16>}, {transform_indices = @transform_4, window_bounds = array<i64: 1, 16, 16>}, {transform_indices = @transform_5, window_bounds = array<i64: 8>}]} {
    %c0 = arith.constant 0 : index
    %c0_0 = arith.constant 0 : index
    %c0_1 = arith.constant 0 : index
    %0 = vector.load %arg4[%c0, %c0_0, %c0_1] : memref<1x16x16xf32, #tpu.memory_space<vmem>>, vector<1x16x16xf32>
    %1 = vector.shape_cast %0 : vector<1x16x16xf32> to vector<16x16xf32>
    %c0_2 = arith.constant 0 : index
    %c0_3 = arith.constant 0 : index
    %c0_4 = arith.constant 0 : index
    %2 = vector.load %arg5[%c0_2, %c0_3, %c0_4] : memref<1x16x16xf32, #tpu.memory_space<vmem>>, vector<1x16x16xf32>
    %3 = vector.shape_cast %2 : vector<1x16x16xf32> to vector<16x16xf32>
    %c0_5 = arith.constant 0 : index
    %c0_6 = arith.constant 0 : index
    %4 = vector.load %arg2[%c0_5, %c0_6] : memref<16x6xf32, #tpu.memory_space<vmem>>, vector<16x6xf32>
    %c0_7 = arith.constant 0 : index
    %c0_8 = arith.constant 0 : index
    %5 = vector.load %arg3[%c0_7, %c0_8] : memref<6x16xf32, #tpu.memory_space<vmem>>, vector<6x16xf32>
    %6 = arith.mulf %1, %1 : vector<16x16xf32>
    %7 = arith.mulf %3, %3 : vector<16x16xf32>
    %8 = arith.mulf %1, %3 : vector<16x16xf32>
    %cst = arith.constant dense<0.000000e+00> : vector<16x6xf32>
    %9 = tpu.matmul %1, %4, %cst {dimension_numbers = #tpu.dot_dimension_numbers<[1], [0], [0], [1], [0, 0, 1, 1], [], []>} : vector<16x16xf32>, vector<16x6xf32>, vector<16x6xf32> -> vector<16x6xf32>
    %cst_9 = arith.constant dense<0.000000e+00> : vector<6x6xf32>
    %10 = tpu.matmul %5, %9, %cst_9 {dimension_numbers = #tpu.dot_dimension_numbers<[1], [0], [0], [1], [0, 0, 1, 1], [], []>} : vector<6x16xf32>, vector<16x6xf32>, vector<6x6xf32> -> vector<6x6xf32>
    %cst_10 = arith.constant dense<0.000000e+00> : vector<16x6xf32>
    %11 = tpu.matmul %3, %4, %cst_10 {dimension_numbers = #tpu.dot_dimension_numbers<[1], [0], [0], [1], [0, 0, 1, 1], [], []>} : vector<16x16xf32>, vector<16x6xf32>, vector<16x6xf32> -> vector<16x6xf32>
    %cst_11 = arith.constant dense<0.000000e+00> : vector<6x6xf32>
    %12 = tpu.matmul %5, %11, %cst_11 {dimension_numbers = #tpu.dot_dimension_numbers<[1], [0], [0], [1], [0, 0, 1, 1], [], []>} : vector<6x16xf32>, vector<16x6xf32>, vector<6x6xf32> -> vector<6x6xf32>
    %cst_12 = arith.constant dense<0.000000e+00> : vector<16x6xf32>
    %13 = tpu.matmul %6, %4, %cst_12 {dimension_numbers = #tpu.dot_dimension_numbers<[1], [0], [0], [1], [0, 0, 1, 1], [], []>} : vector<16x16xf32>, vector<16x6xf32>, vector<16x6xf32> -> vector<16x6xf32>
    %cst_13 = arith.constant dense<0.000000e+00> : vector<6x6xf32>
    %14 = tpu.matmul %5, %13, %cst_13 {dimension_numbers = #tpu.dot_dimension_numbers<[1], [0], [0], [1], [0, 0, 1, 1], [], []>} : vector<6x16xf32>, vector<16x6xf32>, vector<6x6xf32> -> vector<6x6xf32>
    %cst_14 = arith.constant dense<0.000000e+00> : vector<16x6xf32>
    %15 = tpu.matmul %7, %4, %cst_14 {dimension_numbers = #tpu.dot_dimension_numbers<[1], [0], [0], [1], [0, 0, 1, 1], [], []>} : vector<16x16xf32>, vector<16x6xf32>, vector<16x6xf32> -> vector<16x6xf32>
    %cst_15 = arith.constant dense<0.000000e+00> : vector<6x6xf32>
    %16 = tpu.matmul %5, %15, %cst_15 {dimension_numbers = #tpu.dot_dimension_numbers<[1], [0], [0], [1], [0, 0, 1, 1], [], []>} : vector<6x16xf32>, vector<16x6xf32>, vector<6x6xf32> -> vector<6x6xf32>
    %cst_16 = arith.constant dense<0.000000e+00> : vector<16x6xf32>
    %17 = tpu.matmul %8, %4, %cst_16 {dimension_numbers = #tpu.dot_dimension_numbers<[1], [0], [0], [1], [0, 0, 1, 1], [], []>} : vector<16x16xf32>, vector<16x6xf32>, vector<16x6xf32> -> vector<16x6xf32>
    %cst_17 = arith.constant dense<0.000000e+00> : vector<6x6xf32>
    %18 = tpu.matmul %5, %17, %cst_17 {dimension_numbers = #tpu.dot_dimension_numbers<[1], [0], [0], [1], [0, 0, 1, 1], [], []>} : vector<6x16xf32>, vector<16x6xf32>, vector<6x6xf32> -> vector<6x6xf32>
    %19 = arith.mulf %10, %10 : vector<6x6xf32>
    %20 = arith.mulf %12, %12 : vector<6x6xf32>
    %21 = arith.mulf %10, %12 : vector<6x6xf32>
    %22 = arith.subf %14, %19 : vector<6x6xf32>
    %23 = arith.subf %16, %20 : vector<6x6xf32>
    %24 = arith.subf %18, %21 : vector<6x6xf32>
    %c0_18 = arith.constant 0 : index
    %25 = memref.load %arg1[%c0_18] : memref<2xf32, #tpu.memory_space<smem>>
    %c1 = arith.constant 1 : index
    %26 = memref.load %arg1[%c1] : memref<2xf32, #tpu.memory_space<smem>>
    %cst_19 = arith.constant 2.000000e+00 : f32
    %27 = vector.broadcast %cst_19 : f32 to vector<6x6xf32>
    %28 = arith.mulf %27, %21 : vector<6x6xf32>
    %29 = vector.broadcast %25 : f32 to vector<6x6xf32>
    %30 = arith.addf %28, %29 : vector<6x6xf32>
    %cst_20 = arith.constant 2.000000e+00 : f32
    %31 = vector.broadcast %cst_20 : f32 to vector<6x6xf32>
    %32 = arith.mulf %31, %24 : vector<6x6xf32>
    %33 = vector.broadcast %26 : f32 to vector<6x6xf32>
    %34 = arith.addf %32, %33 : vector<6x6xf32>
    %35 = arith.mulf %30, %34 : vector<6x6xf32>
    %36 = arith.addf %19, %20 : vector<6x6xf32>
    %37 = vector.broadcast %25 : f32 to vector<6x6xf32>
    %38 = arith.addf %36, %37 : vector<6x6xf32>
    %39 = arith.addf %22, %23 : vector<6x6xf32>
    %40 = vector.broadcast %26 : f32 to vector<6x6xf32>
    %41 = arith.addf %39, %40 : vector<6x6xf32>
    %42 = arith.mulf %38, %41 : vector<6x6xf32>
    %43 = arith.divf %35, %42 : vector<6x6xf32>
    %44 = vector.shape_cast %43 : vector<6x6xf32> to vector<1x6x6xf32>
    %cst_21 = arith.constant dense<0.000000e+00> : vector<1xf32>
    %45 = vector.multi_reduction <add>, %44, %cst_21 [1, 2] : vector<1x6x6xf32> to vector<1xf32>
    %46 = vector.shape_cast %45 : vector<1xf32> to vector<1x1x1xf32>
    %47 = vector.extract %46[0, 0, 0] : f32 from vector<1x1x1xf32>
    %48 = arith.index_cast %arg0 : i32 to index
    %49 = memref.load %arg6[%48] : memref<8xf32, #tpu.memory_space<smem>>
    memref.store %47, %arg6[%48] : memref<8xf32, #tpu.memory_space<smem>>
    return
  }
  func.func @transform_0(%arg0: i32) -> i32 {
    %c0_i32 = arith.constant 0 : i32
    %c0_i32_0 = arith.constant 0 : i32
    return %c0_i32 : i32
  }
  func.func @transform_1(%arg0: i32) -> (i32, i32) {
    %c0_i32 = arith.constant 0 : i32
    %c0_i32_0 = arith.constant 0 : i32
    %c0_i32_1 = arith.constant 0 : i32
    return %c0_i32, %c0_i32_0 : i32, i32
  }
  func.func @transform_2(%arg0: i32) -> (i32, i32) {
    %c0_i32 = arith.constant 0 : i32
    %c0_i32_0 = arith.constant 0 : i32
    %c0_i32_1 = arith.constant 0 : i32
    return %c0_i32, %c0_i32_0 : i32, i32
  }
  func.func @transform_3(%arg0: i32) -> (i32, i32, i32) {
    %c0_i32 = arith.constant 0 : i32
    %c0_i32_0 = arith.constant 0 : i32
    %c0_i32_1 = arith.constant 0 : i32
    return %arg0, %c0_i32, %c0_i32_0 : i32, i32, i32
  }
  func.func @transform_4(%arg0: i32) -> (i32, i32, i32) {
    %c0_i32 = arith.constant 0 : i32
    %c0_i32_0 = arith.constant 0 : i32
    %c0_i32_1 = arith.constant 0 : i32
    return %arg0, %c0_i32, %c0_i32_0 : i32, i32, i32
  }
  func.func @transform_5(%arg0: i32) -> i32 {
    %c0_i32 = arith.constant 0 : i32
    %c0_i32_0 = arith.constant 0 : i32
    return %c0_i32 : i32
  }
}

</mosaic_0001>

<bundles_post_ra>
// kernel: tpu_custom_call.1
= control target key start
LH: loop header
LB: loop body
LE: loop exit
PB: predicated region body
PF: predicated region fallthrough
CT: control target
= control target key end

     0   :  { %10 = vsyncpa [#allocation5], 0  ;;  %s1781_s0 = inlined_call_operand.vmem [shape: f32[2], index: 0, kind: input, shape index: {}]   ;;  %s1782_s1 = inlined_call_operand.vmem [shape: f32[16,6], index: 1, kind: input, shape index: {}]   ;;  %s1783_s2 = inlined_call_operand.vmem [shape: f32[6,16], index: 2, kind: input, shape index: {}]   ;;  %s1784_s3 = inlined_call_operand.hbm [shape: f32[8,16,16], index: 3, kind: input, shape index: {}]   ;;  %s1785_s4 = inlined_call_operand.hbm [shape: f32[8,16,16], index: 4, kind: input, shape index: {}]   ;;  %s1786_s5 = inlined_call_operand.hbm [shape: f32[8], index: 5, kind: output, shape index: {}]  }
   0x1   :  { %11 = vsyncpa [#allocation3], 0 }
   0x2   :  { %13 = vsyncpa [#allocation3 + $0x1], 0 }
   0x3   :  { %14 = vsyncpa [#allocation8], 0 }
   0x4   :  { %16 = vsyncpa [#allocation8 + $0x1], 0 }
   0x5   :  { %17 = vsyncpa [#allocation4], 0  ;;  %s1565_s18 = smov 0   ;;  %s1567_s19 = smov 0  }
   0x6   :  { %s1569_s20 = smov 0   ;;  %s1571_s21 = smov 0  }
   0x7 LB: > { %s1184_s22 = sadd.s32 4294967295, %s1525_s21   ;;  %s1585_s23 = sadd.s32 1, %s1525_s21   ;;  %s1525_s21 = sphi %s1571_s21, %s1799_s21   ;;  %s1521_s20 = sphi %s1569_s20, %s1798_s20   ;;  %s1517_s19 = sphi %s1567_s19, %s1797_s19   ;;  %s1513_s18 = sphi %s1565_s18, %s1796_s18  }
   0x8   : > { %s90_s24 = ssub.s32 %s1525_s21, %s1585_s23  ;;  %s93_s25 = sadd.s32 1, %s1521_s20 }
   0x9   : > { %p91_p0 = scmp.eq.s32.totalorder %s90_s24, 0  ;;  %p100_p1 = scmp.ne.s32.totalorder %s1521_s20, %s1517_s19 }
   0xa   : > { %p101_p2 = scmp.eq.s32.totalorder %s1525_s21, 0  ;;  %p106_p3 = scmp.ne.s32.totalorder %s1517_s19, %s1513_s18 }
   0xb   : > { %s1595_s26 = scalar_select %p91_p0, %s1521_s20, %s93_s25  }
   0xc   : > { %p102_p4 = por %p101_p2, %p100_p1  ;;  %p1599_p5 = scmp.eq.s32.totalorder %s1184_s22, 0 }
   0xd   : > { %p1185_p6 = scmp.ge.s32.totalorder %s1525_s21, 1  ;;  %p164_p7 = scmp.lt.s32.totalorder %s1525_s21, 9 }
   0xe   : > { %p1607_p8 = por %p1599_p5, %p106_p3  ;;  %s177_s7 = sshll.u32 %s1781_s0, 4  ;;  %s178_s7 = int_to_ptr.vmem [resolvable:$true] %s177_s7 }
   0xf   : > { %p1611_p9 = pnand %p1185_p6, %p164_p7  ;;  %p1354_p11 = scmp.lt.s32.totalorder %s1525_s21, 8 }
  0x10   : > { %s1790_s28 = scalar_select %p1607_p8, 1, 0 }
  0x11   : > { %s1791_s29 = scalar_select %p1611_p9, 1, 0 }
  0x12   : > { %p1342_p10 = pneg %p1611_p9  ;;  %s1622_s8 = sand.u32 1, %s1521_s20  }
  0x13   : > { %p1630_p13 = pnand %p1354_p11, %p102_p4  ;;  %s1188_s11 = sshll.u32 %s1622_s8, 4 }
  0x14   : > { %p1626_p12 = pnand %p1342_p10, %p1599_p5  ;;  %s1398_s12 = scalar_lea.vmem %s178_s7, 16 }
  0x15   : > { %p1399_p0 = scmp.ne.s32.totalorder %s178_s7, %s1398_s12  ;;  %p1406_p6 = scmp.lt.s32.totalorder %s178_s7, %s178_s7 }
  0x16   : > { %p1400_p1 = pneg %p1626_p12  ;;  %p1407_p7 = scmp.lt.s32.totalorder %s1398_s12, %s1398_s12 }
  0x18   : > { %p1401_p2 = pnand %p1400_p1, %p1399_p0  ;;  %p1408_p8 = por %p1407_p7, %p1406_p6 }
  0x1a   : > { %p1402_p3 = pneg %p1401_p2 }
  0x1c   : > { %p1409_p9 = pnand %p1408_p8, %p1402_p3 }
  0x1e   : > { %1412 = shalt.err (!%p1409_p9)
}
  0x1f   : > { %s1527_s13 = smov [#allocation2]   ;;  %s1219_s14 = sshll.u32 %s1525_s21, 8 }
  0x20   : > { %1345 = dma.vmem_to_smem (!%p1626_p12), %s178_s7, 16, %s1527_s13, [#allocation5]  }
  0x21   : > { %s1645_s17 = scalar_lea.hbm %s1784_s3, %s1219_s14  ;;  %s198_s18 = scalar_lea.vmem [#allocation6], %s1188_s11 }
  0x22   : > { %s205_s24 = sshll.u32 %s198_s18, 4  ;;  %s195_s25 = scalar_lea.sflag [#allocation3], %s1622_s8  ;;  %s1649_s24 = int_to_ptr.vmem [resolvable:$true] %s205_s24 }
  0x23   : > { %s1413_s30 = scalar_lea.hbm %s1645_s17, 256  ;;  %p1415_p8 = pneg %p1630_p13 }
  0x24   : > { %p1414_p4 = scmp.ne.s32.totalorder %s1645_s17, %s1413_s30  ;;  %s1418_s9 = scalar_lea.hbm %s1784_s3, 2048 }
  0x25   : > { %p1419_p11 = scmp.lt.s32.totalorder %s1645_s17, %s1784_s3  ;;  %p1420_p12 = scmp.lt.s32.totalorder %s1418_s9, %s1413_s30 }
  0x26   : > { %p1416_p9 = pnand %p1415_p8, %p1414_p4 }
  0x27   : > { %p1421_p0 = por %p1420_p12, %p1419_p11 }
  0x28   : > { %p1417_p10 = pneg %p1416_p9 }
  0x2a   : > { %p1422_p1 = pnand %p1421_p0, %p1417_p10 }
  0x2c   : > { %1425 = shalt.err (!%p1422_p1)
}
  0x2d   : > { %s1426_s15 = scalar_lea.vmem %s1649_s24, 256  ;;  %s1528_s16 = smov [#allocation6]  }
  0x2e   : > { %p1427_p2 = scmp.ne.s32.totalorder %s1649_s24, %s1426_s15  ;;  %s1431_s18 = sshll.u32 %s1528_s16, 4  ;;  %s1432_s18 = int_to_ptr.vmem [resolvable:$false] %s1431_s18 }
  0x2f   : > { %s1433_s6 = scalar_lea.vmem %s1432_s18, 512  ;;  %p1434_p7 = scmp.lt.s32.totalorder %s1649_s24, %s1432_s18 }
  0x30   : > { %p1429_p3 = pnand %p1427_p2, %p1415_p8  ;;  %p1435_p4 = scmp.lt.s32.totalorder %s1433_s6, %s1426_s15 }
  0x32   : > { %p1430_p6 = pneg %p1429_p3  ;;  %p1436_p9 = por %p1435_p4, %p1434_p7 }
  0x34   : > { %p1437_p11 = pnand %p1436_p9, %p1430_p6 }
  0x36   : > { %1440 = shalt.err (!%p1437_p11)
}
  0x37   : > { %s1529_s30 = smov 128   ;;  %s1530_s7 = smov 8  }
  0x38   : > { %1349 = dma.hbm_to_vmem [thread:$0]  (!%p1630_p13), %s1645_s17, 256, %s1649_s24, %s195_s25, %s1529_s30, %s1529_s30, %s1530_s7  }
  0x39   : > { %s1686_s13 = scalar_lea.hbm %s1785_s4, %s1219_s14  ;;  %s219_s15 = scalar_lea.vmem [#allocation7], %s1188_s11 }
  0x3a   : > { %s226_s16 = sshll.u32 %s219_s15, 4  ;;  %s216_s18 = scalar_lea.sflag [#allocation8], %s1622_s8  ;;  %s1690_s16 = int_to_ptr.vmem [resolvable:$true] %s226_s16 }
  0x3b   : > { %s1441_s6 = scalar_lea.hbm %s1686_s13, 256  ;;  %s1446_s14 = scalar_lea.hbm %s1785_s4, 2048 }
  0x3c   : > { %p1442_p10 = scmp.ne.s32.totalorder %s1686_s13, %s1441_s6  ;;  %p1447_p1 = scmp.lt.s32.totalorder %s1686_s13, %s1785_s4 }
  0x3d   : > { %p1448_p2 = scmp.lt.s32.totalorder %s1446_s14, %s1441_s6 }
  0x3e   : > { %p1444_p12 = pnand %p1442_p10, %p1415_p8 }
  0x3f   : > { %p1449_p3 = por %p1448_p2, %p1447_p1 }
  0x40   : > { %p1445_p0 = pneg %p1444_p12 }
  0x42   : > { %p1450_p6 = pnand %p1449_p3, %p1445_p0 }
  0x44   : > { %1453 = shalt.err (!%p1450_p6)
}
  0x45   : > { %s1454_s8 = scalar_lea.vmem %s1690_s16, 256  ;;  %s1531_s11 = smov [#allocation7]  }
  0x46   : > { %p1455_p7 = scmp.ne.s32.totalorder %s1690_s16, %s1454_s8  ;;  %s1459_s12 = sshll.u32 %s1531_s11, 4  ;;  %s1460_s12 = int_to_ptr.vmem [resolvable:$false] %s1459_s12 }
  0x47   : > { %s1461_s15 = scalar_lea.vmem %s1460_s12, 512  ;;  %p1462_p11 = scmp.lt.s32.totalorder %s1690_s16, %s1460_s12 }
  0x48   : > { %p1457_p4 = pnand %p1455_p7, %p1415_p8  ;;  %p1463_p10 = scmp.lt.s32.totalorder %s1461_s15, %s1454_s8 }
  0x4a   : > { %p1458_p9 = pneg %p1457_p4  ;;  %p1464_p12 = por %p1463_p10, %p1462_p11 }
  0x4c   : > { %p1465_p1 = pnand %p1464_p12, %p1458_p9 }
  0x4e   : > { %1468 = shalt.err (!%p1465_p1)
}
  0x4f   : > { %1352 = dma.hbm_to_vmem [thread:$0]  (!%p1630_p13), %s1686_s13, 256, %s1690_s16, %s216_s18, %s1529_s30, %s1529_s30, %s1530_s7  }
  0x50   : > { %p1794_p8 = scmp.ne.s32.totalorder %s1791_s29, 0 }
  0x52   : > { %238 = sbr.rel (%p1794_p8) target bundleno = 732 (0x2dc), region = 40 }
  0x57   : > { %1496 = dma.done.wait (%p1599_p5), [#allocation5], 16  }
  0x58   : > { %1498 = vsyncadd (%p1599_p5), [#allocation5], 4294967280  ;;  %s244_s6 = sand.u32 1, %s1517_s19   ;;  %p1795_p0 = scmp.ne.s32.totalorder %s1790_s28, 0 }
  0x59   : > { %s1196_s17 = sshll.u32 %s244_s6, 4  ;;  %s245_s10 = scalar_lea.sflag [#allocation3], %s244_s6 }
  0x5a   : > { %s248_s24 = scalar_lea.vmem [#allocation6], %s1196_s17 }
  0x5b   : > { %1500 = dma.done.wait (%p1795_p0), %s245_s10, 256  }
  0x5c   : > { %1502 = vsyncadd (%p1795_p0), %s245_s10, 4294967040  ;;  %s254_s29 = scalar_lea.sflag [#allocation8], %s244_s6  ;;  %s257_s30 = scalar_lea.vmem [#allocation7], %s1196_s17 }
  0x5d   : > { %1504 = dma.done.wait (%p1795_p0), %s254_s29, 256  }
  0x5e   : > { %1506 = vsyncadd (%p1795_p0), %s254_s29, 4294967040 }
  0x5f   : > { %262 = sfence }
  0x60   : > { %v290_v0 = vld [vmem:[%s1782_s1 + $0x8] sm:$0xff]  ;;  %v289_v1 = vld [vmem:[%s1782_s1] sm:$0xff]  ;;  %vm298_vm0 = vcmask 130048   ;;  %v1532_v12 = vmov 0.0   ;;  %vm1533_vm1 = vmmov 0   ;;  %s1063_s14 = sld [smem:[#allocation2]] }
  0x61   : > { %v285_v2 = vld [vmem:[%s248_s24] sm:$0xff]  ;;  %1258 = vmatprep.subr.mxu0 %v290_v0  ;;  %v286_v3 = vld [vmem:[%s248_s24 + $0x8] sm:$0xff]  ;;  %1265 = vmatprep.subr.mxu1 %v1532_v12  ;;  %s1213_s25 = sld [smem:[#allocation2 + $0x1]]  ;;  %vm1079_vm2 = vcmask 46080   ;;  %s1221_s9 = scalar_lea.smem [#allocation9], %s1525_s21 }
  0x62   : > { %1262 = vmatprep.mubr.msk.f32.mxu0 %vm298_vm0, %v285_v2  ;;  %1259 = vmatpush3.msra.mxu0 %v290_v0  ;;  %v287_v4 = vld [vmem:[%s257_s30] sm:$0xff]  ;;  %v292_v5 = vmul.f32 %v285_v2, %v285_v2  ;;  %v288_v6 = vld [vmem:[%s257_s30 + $0x8] sm:$0xff]  ;;  %v293_v7 = vmul.f32 %v286_v3, %v286_v3  ;;  %s1222_s8 = scalar_lea.smem %s1221_s9, 4294967295 [#allocation9]  ;;  %p1356_p5 = scmp.eq.s32.totalorder %s1184_s22, 7 }
  0x63   : > { %1260 = vmatprep.subr.mxu0 %v289_v1  ;;  %v294_v8 = vmul.f32 %v287_v4, %v287_v4  ;;  %v295_v9 = vmul.f32 %v288_v6, %v288_v6  ;;  %v296_v10 = vmul.f32 %v287_v4, %v285_v2  ;;  %v297_v11 = vmul.f32 %v288_v6, %v286_v3  ;;  %v291_v14 = vld [vmem:[%s1783_s2] sm:$0x3f]  ;;  %s1534_s12 = smov [#allocation9]  }
  0x64   : > { %1261 = vmatpush3.msra.mxu0 %v289_v1  ;;  %1269 = vmatprep.mubr.msk.f32.mxu1 %vm1533_vm1, %v1532_v12 }
  0x65   : > { %1263 = vmatmul.mubr.msk.f32.vlgmr.msra.gmra.mxu0 %vm298_vm0, %v286_v3  ;;  %1272 = vmatprep.subr.mxu0 %v290_v0 }
  0x66   : > { %1273 = vmatpush3.msra.mxu0 %v290_v0  ;;  %1276 = vmatprep.mubr.msk.f32.mxu0 %vm298_vm0, %v287_v4  ;;  %v1066_v36 = vstv %s1063_s14 }
  0x67   : > { %1274 = vmatprep.subr.mxu0 %v289_v1  ;;  %v1069_v38 = vstv %s1213_s25 }
  0x68   : > { %1275 = vmatpush3.msra.mxu0 %v289_v1 }
  0x69   : > { %1277 = vmatmul.mubr.msk.f32.vlgmr.msra.gmra.mxu0 %vm298_vm0, %v288_v6  ;;  %1286 = vmatprep.subr.mxu0 %v290_v0 }
  0x6a   : > { %1287 = vmatpush3.msra.mxu0 %v290_v0  ;;  %1290 = vmatprep.mubr.msk.f32.mxu0 %vm298_vm0, %v292_v5 }
  0x6b   : > { %1288 = vmatprep.subr.mxu0 %v289_v1 }
  0x6c   : > { %1289 = vmatpush3.msra.mxu0 %v289_v1 }
  0x6d   : > { %1291 = vmatmul.mubr.msk.f32.vlgmr.msra.gmra.mxu0 %vm298_vm0, %v293_v7  ;;  %1300 = vmatprep.subr.mxu0 %v290_v0 }
  0x6e   : > { %1301 = vmatpush3.msra.mxu0 %v290_v0  ;;  %1304 = vmatprep.mubr.msk.f32.mxu0 %vm298_vm0, %v294_v8 }
  0x6f   : > { %1302 = vmatprep.subr.mxu0 %v289_v1 }
  0x70   : > { %1303 = vmatpush3.msra.mxu0 %v289_v1 }
  0x71   : > { %1305 = vmatmul.mubr.msk.f32.vlgmr.msra.gmra.mxu0 %vm298_vm0, %v295_v9  ;;  %1314 = vmatprep.subr.mxu0 %v290_v0 }
  0x72   : > { %1315 = vmatpush3.msra.mxu0 %v290_v0  ;;  %1318 = vmatprep.mubr.msk.f32.mxu0 %vm298_vm0, %v296_v10 }
  0x73   : > { %1316 = vmatprep.subr.mxu0 %v289_v1 }
  0x74   : > { %1317 = vmatpush3.msra.mxu0 %v289_v1 }
  0x75   : > { %1319 = vmatmul.mubr.msk.f32.vlgmr.msra.gmra.mxu0 %vm298_vm0, %v297_v11 }
 0x125   : > { %v1264_v13 = vpop.f32.mrf.mxu0 }
 0x126   : > { %1266 = vmatpush3.msra.mxu1 %v1264_v13 }
 0x127   : > { %v371_v15 = vpop.f32.mrf.mxu0  ;;  %1267 = vmatprep.subr.mxu1 %v1532_v12 }
 0x128   : > { %1268 = vmatpush3.msra.mxu1 %v371_v15 }
 0x129   : > { %1270 = vmatmul.mubr.msk.f32.vlgmr.msra.gmra.mxu1 %vm298_vm0, %v291_v14  ;;  %v1278_v16 = vpop.f32.mrf.mxu0  ;;  %1279 = vmatprep.subr.mxu1 %v1532_v12 }
 0x12a   : > { %1280 = vmatpush3.msra.mxu1 %v1278_v16  ;;  %1283 = vmatprep.mubr.msk.f32.mxu1 %vm1533_vm1, %v1532_v12 }
 0x12b   : > { %v525_v17 = vpop.f32.mrf.mxu0  ;;  %1281 = vmatprep.subr.mxu1 %v1532_v12 }
 0x12c   : > { %1282 = vmatpush3.msra.mxu1 %v525_v17 }
 0x12d   : > { %1284 = vmatmul.mubr.msk.f32.vlgmr.msra.gmra.mxu1 %vm298_vm0, %v291_v14  ;;  %v1292_v18 = vpop.f32.mrf.mxu0  ;;  %1293 = vmatprep.subr.mxu1 %v1532_v12 }
 0x12e   : > { %1294 = vmatpush3.msra.mxu1 %v1292_v18  ;;  %1297 = vmatprep.mubr.msk.f32.mxu1 %vm1533_vm1, %v1532_v12 }
 0x12f   : > { %v676_v19 = vpop.f32.mrf.mxu0  ;;  %1295 = vmatprep.subr.mxu1 %v1532_v12 }
 0x130   : > { %1296 = vmatpush3.msra.mxu1 %v676_v19 }
 0x131   : > { %1298 = vmatmul.mubr.msk.f32.vlgmr.msra.gmra.mxu1 %vm298_vm0, %v291_v14  ;;  %v1306_v20 = vpop.f32.mrf.mxu0  ;;  %1307 = vmatprep.subr.mxu1 %v1532_v12 }
 0x132   : > { %1308 = vmatpush3.msra.mxu1 %v1306_v20  ;;  %1311 = vmatprep.mubr.msk.f32.mxu1 %vm1533_vm1, %v1532_v12 }
 0x133   : > { %v827_v21 = vpop.f32.mrf.mxu0  ;;  %1309 = vmatprep.subr.mxu1 %v1532_v12 }
 0x134   : > { %1310 = vmatpush3.msra.mxu1 %v827_v21 }
 0x135   : > { %1312 = vmatmul.mubr.msk.f32.vlgmr.msra.gmra.mxu1 %vm298_vm0, %v291_v14  ;;  %v1320_v22 = vpop.f32.mrf.mxu0  ;;  %1321 = vmatprep.subr.mxu1 %v1532_v12 }
 0x136   : > { %1322 = vmatpush3.msra.mxu1 %v1320_v22  ;;  %1325 = vmatprep.mubr.msk.f32.mxu1 %vm1533_vm1, %v1532_v12 }
 0x137   : > { %v978_v23 = vpop.f32.mrf.mxu0  ;;  %1323 = vmatprep.subr.mxu1 %v1532_v12 }
 0x138   : > { %1324 = vmatpush3.msra.mxu1 %v978_v23 }
 0x139   : > { %1326 = vmatmul.mubr.msk.f32.vlgmr.msra.gmra.mxu1 %vm298_vm0, %v291_v14 }
 0x1e9   : > { %v449_v24 = vpop.f32.mrf.mxu1 }
 0x1ea   : > { %v1057_v31 = vmul.f32 %v449_v24, %v449_v24 }
 0x1eb   : > { %v1271_v25 = vpop.f32.mrf.mxu1 }
 0x1ed   : > { %v600_v26 = vpop.f32.mrf.mxu1 }
 0x1ee   : > { %v1058_v29 = vmul.f32 %v600_v26, %v600_v26  ;;  %v1059_v44 = vmul.f32 %v600_v26, %v449_v24 }
 0x1ef   : > { %v1285_v27 = vpop.f32.mrf.mxu1 }
 0x1f0   : > { %v1072_v33 = vadd.f32 %v1058_v29, %v1057_v31  ;;  %v1065_v48 = vmul.f32 2.0, %v1059_v44 }
 0x1f1   : > { %v751_v28 = vpop.f32.mrf.mxu1 }
 0x1f2   : > { %v1060_v34 = vsub.f32 %v751_v28, %v1057_v31  ;;  %v1073_v41 = vadd.f32 %v1072_v33, %v1066_v36  ;;  %v1067_v50 = vadd.f32 %v1066_v36, %v1065_v48 }
 0x1f3   : > { %v1299_v30 = vpop.f32.mrf.mxu1 }
 0x1f5   : > { %v902_v32 = vpop.f32.mrf.mxu1 }
 0x1f6   : > { %v1061_v35 = vsub.f32 %v902_v32, %v1058_v29 }
 0x1f7   : > { %v1313_v37 = vpop.f32.mrf.mxu1 }
 0x1f8   : > { %v1074_v39 = vadd.f32 %v1061_v35, %v1060_v34 }
 0x1f9   : > { %v1053_v40 = vpop.f32.mrf.mxu1 }
 0x1fa   : > { %v1075_v42 = vadd.f32 %v1074_v39, %v1069_v38  ;;  %v1062_v46 = vsub.f32 %v1053_v40, %v1059_v44 }
 0x1fb   : > { %v1327_v43 = vpop.f32.mrf.mxu1 }
 0x1fc   : > { %v1076_v45 = vmul.f32 %v1075_v42, %v1073_v41  ;;  %v1068_v47 = vmul.f32 2.0, %v1062_v46 }
 0x1fe   : > { %1396 = vrcp.f32 %v1076_v45  ;;  %v1070_v49 = vadd.f32 %v1069_v38, %v1068_v47 }
 0x200   : > { %v1071_v51 = vmul.f32 %v1070_v49, %v1067_v50 }
 0x20b   : > { %v1397_v52 = vpop.eup %1396 }
 0x20c   : > { %v1078_v53 = vmul.f32 %v1397_v52, %v1071_v51 }
 0x20e   : > { %v1080_v54 = vsel %vm1079_vm2, %v1078_v53, 0.0 }
 0x20f   : > { %1081 = vadd.xlane.f32.xlu0 %v1080_v54 }
 0x298   : > { %v1082_v55 = vpop.xlane.xlu0 %1081 }
 0x299   : > { %v1083_v56 = vrot.slane %v1082_v55, 4 }
 0x29b   : > { %v1084_v57 = vadd.f32 %v1083_v56, %v1082_v55 }
 0x29d   : > { %v1085_v58 = vrot.slane %v1084_v57, 2 }
 0x29f   : > { %v1086_v59 = vadd.f32 %v1085_v58, %v1084_v57 }
 0x2a1   : > { %v1087_v60 = vrot.slane %v1086_v59, 1 }
 0x2a3   : > { %v1088_v61 = vadd.f32 %v1087_v60, %v1086_v59 }
 0x2a5   : > { %1328 = vpush %v1088_v61 }
 0x2d6   : > { %s1329_s11 = spop %1328 }
 0x2d7   : > { %1091 = sst [smem:[%s1222_s8]] %s1329_s11 }
 0x2d8   : > { %1339 = dma.smem_to_hbm (%p1356_p5), %s1534_s12, 16, %s1786_s5, [#allocation4]  }
 0x2d9   : > { %1508 = dma.done.wait (%p1356_p5), [#allocation4], 16  }
 0x2da   : > { %1510 = vsyncadd (%p1356_p5), [#allocation4], 4294967280 }
 0x2db   : > { %1105 = sfence }
 0x2dc PF: > { %p20_p13 = scmp.ge.s32.totalorder %s1585_s23, 10   ;;  %s1796_s18 = smov %s1517_s19 }
 0x2dd   : > { %s1797_s19 = smov %s1521_s20  ;;  %s1798_s20 = smov %s1595_s26 }
 0x2de   : > { %s1799_s21 = smov %s1585_s23  ;;  %22 = sbr.rel (!%p20_p13) target bundleno = 7 (0x7), region = 96 }
 0x2e3   :  { %1111 = vsyncpa [#allocation3], 1 }
 0x2e4   :  { %1113 = vsyncpa [#allocation3 + $0x1], 1 }
 0x2e5   :  { %1114 = vsyncpa [#allocation8], 1 }
 0x2e6   :  { %1116 = vsyncpa [#allocation8 + $0x1], 1 }
 0x2e7   :  { %1117 = vsyncpa [#allocation4], 1 }
 0x2e8   :  { %1119 = vsyncpa [#allocation4 + $0x1], 1 }
 0x2e9   :  { %1120 = vsyncpa [#allocation5], 1 }
 0x2ea   :  { %1122 = vsyncpa [#allocation5 + $0x1], 1 }

</bundles_post_ra>
